<compile_context>
chip_gen: v5e
topology: v5e:2x2
jax: 0.10.0
libtpu: 0.0.40
codegen_flags: <defaults>
</compile_context>

<pallas_src>
import functools

import jax
import jax.numpy as jnp
from jax.experimental import pallas as pl
from jax.experimental.pallas import tpu as pltpu


def _make_contrastive_loss_kernel(margin: float, max_violation: bool):
    def kernel(im_ref, s_ref, o_ref):
        im = im_ref[...].astype(jnp.float32)   # (B, E) image embeddings
        s = s_ref[...].astype(jnp.float32)     # (B, E) sentence embeddings

        # scores[i, j] = <s_i, im_j>  — one MXU matmul over the whole batch.
        scores = jax.lax.dot_general(
            s, im,
            dimension_numbers=(((1,), (1,)), ((), ())),
            preferred_element_type=jnp.float32,
        )                                      # (B, B)

        rows = jax.lax.broadcasted_iota(jnp.int32, scores.shape, 0)
        cols = jax.lax.broadcasted_iota(jnp.int32, scores.shape, 1)
        diag_mask = rows == cols

        # Diagonal as column / row vectors without gathers:
        # d_col[i, 0] = scores[i, i],  d_row[0, j] = scores[j, j]
        masked_diag = jnp.where(diag_mask, scores, 0.0)
        d_col = jnp.sum(masked_diag, axis=1, keepdims=True)   # (B, 1)
        d_row = jnp.sum(masked_diag, axis=0, keepdims=True)   # (1, B)

        cost_s = jnp.maximum(margin + scores - d_col, 0.0)    # caption-anchored
        cost_im = jnp.maximum(margin + scores - d_row, 0.0)   # image-anchored

        # Zero the diagonal (positive pairs).
        cost_s = jnp.where(diag_mask, 0.0, cost_s)
        cost_im = jnp.where(diag_mask, 0.0, cost_im)

        if max_violation:
            loss = (jnp.sum(jnp.max(cost_s, axis=1, keepdims=True), keepdims=True)
                    + jnp.sum(jnp.max(cost_im, axis=0, keepdims=True), keepdims=True))
        else:
            loss = (jnp.sum(cost_s, keepdims=True)
                    + jnp.sum(cost_im, keepdims=True))

        o_ref[...] = loss                                      # (1, 1) scalar store

    return kernel


@functools.partial(jax.jit, static_argnames=("margin", "max_violation"))
def contrastive_loss(im, s, s_l=None, *, margin: float = 0.0,
                     max_violation: bool = False):
    """im: (B, E), s: (B, E).  s_l is unused by this forward (kept for parity)."""
    del s_l  # not used in ContrastiveLoss.forward
    out = pl.pallas_call(
        _make_contrastive_loss_kernel(float(margin), bool(max_violation)),
        out_shape=jax.ShapeDtypeStruct((1, 1), jnp.float32),
        in_specs=[
            pl.BlockSpec(memory_space=pltpu.MemorySpace.VMEM),
            pl.BlockSpec(memory_space=pltpu.MemorySpace.VMEM),
        ],
        out_specs=pl.BlockSpec(memory_space=pltpu.MemorySpace.VMEM),
    )(im, s)
    return out[0, 0]


def reference(im, s, margin, max_violation):
    scores = s @ im.T
    diag = jnp.diag(scores).reshape(-1, 1)
    cost_s = jnp.clip(margin + scores - diag, min=0.0)
    cost_im = jnp.clip(margin + scores - diag.T, min=0.0)
    eye = jnp.eye(scores.shape[0], dtype=bool)
    cost_s = jnp.where(eye, 0.0, cost_s)
    cost_im = jnp.where(eye, 0.0, cost_im)
    if max_violation:
        cost_s = jnp.max(cost_s, axis=1)
        cost_im = jnp.max(cost_im, axis=0)
    return jnp.sum(cost_s) + jnp.sum(cost_im)


if __name__ == "__main__":
    key = jax.random.PRNGKey(0)
    B, E = 8, 128   # small batch of joint embeddings (lane-aligned embed dim)

    k1, k2 = jax.random.split(key, 2)
    im = jax.random.normal(k1, (B, E), dtype=jnp.float32)
    s = jax.random.normal(k2, (B, E), dtype=jnp.float32)
    s_l = jnp.full((B,), E, dtype=jnp.int32)   # unused by the loss forward

    ok = True
    for margin, max_violation in [(0.0, False), (0.2, False), (0.2, True)]:
        out = contrastive_loss(im, s, s_l, margin=margin,
                               max_violation=max_violation)
        out = jax.block_until_ready(out)
        ref = reference(im, s, margin, max_violation)
        ok = ok and bool(jnp.allclose(out, ref, atol=1e-4, rtol=1e-5))

    assert ok
    print("KERNEL_OK")
</pallas_src>

<mosaic_0001>
module attributes {stable_mosaic.version = 11 : i64} {
  func.func @kernel(%arg0: memref<8x128xf32, #tpu.memory_space<vmem>>, %arg1: memref<8x128xf32, #tpu.memory_space<vmem>>, %arg2: memref<1x1xf32, #tpu.memory_space<vmem>>) attributes {dimension_semantics = [], scalar_prefetch = 0 : i64, scratch_operands = 0 : i64, tpu.core_type = #tpu.core_type<tc>} {
    %c0 = arith.constant 0 : index
    %c0_0 = arith.constant 0 : index
    %0 = vector.load %arg0[%c0, %c0_0] : memref<8x128xf32, #tpu.memory_space<vmem>>, vector<8x128xf32>
    %c0_1 = arith.constant 0 : index
    %c0_2 = arith.constant 0 : index
    %1 = vector.load %arg1[%c0_1, %c0_2] : memref<8x128xf32, #tpu.memory_space<vmem>>, vector<8x128xf32>
    %cst = arith.constant dense<0.000000e+00> : vector<8x8xf32>
    %2 = tpu.matmul %1, %0, %cst {dimension_numbers = #tpu.dot_dimension_numbers<[1], [1], [0], [0], [0, 0, 1, 0], [], []>} : vector<8x128xf32>, vector<8x128xf32>, vector<8x8xf32> -> vector<8x8xf32>
    %3 = tpu.iota {dimensions = array<i32: 0>} : vector<8x8xi32>
    %4 = tpu.iota {dimensions = array<i32: 1>} : vector<8x8xi32>
    %5 = arith.cmpi eq, %3, %4 : vector<8x8xi32>
    %cst_3 = arith.constant 0.000000e+00 : f32
    %6 = vector.broadcast %cst_3 : f32 to vector<8x8xf32>
    %7 = arith.select %5, %2, %6 : vector<8x8xi1>, vector<8x8xf32>
    %cst_4 = arith.constant dense<0.000000e+00> : vector<8xf32>
    %8 = vector.multi_reduction <add>, %7, %cst_4 [1] : vector<8x8xf32> to vector<8xf32>
    %9 = vector.shape_cast %8 : vector<8xf32> to vector<8x1xf32>
    %cst_5 = arith.constant dense<0.000000e+00> : vector<8xf32>
    %10 = vector.multi_reduction <add>, %7, %cst_5 [0] : vector<8x8xf32> to vector<8xf32>
    %11 = vector.shape_cast %10 : vector<8xf32> to vector<1x8xf32>
    %cst_6 = arith.constant 0.000000e+00 : f32
    %12 = vector.broadcast %cst_6 : f32 to vector<8x8xf32>
    %13 = arith.addf %12, %2 : vector<8x8xf32>
    %14 = vector.broadcast %9 : vector<8x1xf32> to vector<8x8xf32>
    %15 = arith.subf %13, %14 : vector<8x8xf32>
    %cst_7 = arith.constant 0.000000e+00 : f32
    %16 = vector.broadcast %cst_7 : f32 to vector<8x8xf32>
    %17 = arith.maximumf %15, %16 : vector<8x8xf32>
    %cst_8 = arith.constant 0.000000e+00 : f32
    %18 = vector.broadcast %cst_8 : f32 to vector<8x8xf32>
    %19 = arith.addf %18, %2 : vector<8x8xf32>
    %20 = vector.broadcast %11 : vector<1x8xf32> to vector<8x8xf32>
    %21 = arith.subf %19, %20 : vector<8x8xf32>
    %cst_9 = arith.constant 0.000000e+00 : f32
    %22 = vector.broadcast %cst_9 : f32 to vector<8x8xf32>
    %23 = arith.maximumf %21, %22 : vector<8x8xf32>
    %cst_10 = arith.constant 0.000000e+00 : f32
    %24 = vector.broadcast %cst_10 : f32 to vector<8x8xf32>
    %25 = arith.select %5, %24, %17 : vector<8x8xi1>, vector<8x8xf32>
    %cst_11 = arith.constant 0.000000e+00 : f32
    %26 = vector.broadcast %cst_11 : f32 to vector<8x8xf32>
    %27 = arith.select %5, %26, %23 : vector<8x8xi1>, vector<8x8xf32>
    %28 = vector.shape_cast %25 : vector<8x8xf32> to vector<1x8x8xf32>
    %cst_12 = arith.constant dense<0.000000e+00> : vector<1xf32>
    %29 = vector.multi_reduction <add>, %28, %cst_12 [1, 2] : vector<1x8x8xf32> to vector<1xf32>
    %30 = vector.shape_cast %29 : vector<1xf32> to vector<1x1x1xf32>
    %31 = vector.extract %30[0, 0, 0] : f32 from vector<1x1x1xf32>
    %32 = vector.broadcast %31 : f32 to vector<1x1xf32>
    %33 = vector.shape_cast %27 : vector<8x8xf32> to vector<1x8x8xf32>
    %cst_13 = arith.constant dense<0.000000e+00> : vector<1xf32>
    %34 = vector.multi_reduction <add>, %33, %cst_13 [1, 2] : vector<1x8x8xf32> to vector<1xf32>
    %35 = vector.shape_cast %34 : vector<1xf32> to vector<1x1x1xf32>
    %36 = vector.extract %35[0, 0, 0] : f32 from vector<1x1x1xf32>
    %37 = vector.broadcast %36 : f32 to vector<1x1xf32>
    %38 = arith.addf %32, %37 : vector<1x1xf32>
    %c0_14 = arith.constant 0 : index
    %c0_15 = arith.constant 0 : index
    %39 = vector.load %arg2[%c0_14, %c0_15] : memref<1x1xf32, #tpu.memory_space<vmem>>, vector<1x1xf32>
    tpu.vector_store %arg2[%c0_14, %c0_15], %38 {strides = array<i32>} : memref<1x1xf32, #tpu.memory_space<vmem>>, vector<1x1xf32>,
    return
  }
}

</mosaic_0001>

<bundles_post_ra>
// kernel: contrastive_loss.1
= control target key start
LH: loop header
LB: loop body
LE: loop exit
PB: predicated region body
PF: predicated region fallthrough
CT: control target
= control target key end

     0   :  { %7 = vsyncpa [#allocation3], 0  ;;  %s246_s0 = inlined_call_operand.hbm [shape: f32[8,128], index: 0, kind: input, shape index: {}]   ;;  %s247_s1 = inlined_call_operand.hbm [shape: f32[8,128], index: 1, kind: input, shape index: {}]   ;;  %s248_s2 = inlined_call_operand.hbm [shape: f32[1,1], index: 2, kind: output, shape index: {}]  }
   0x1   :  { %8 = vsyncpa [#allocation6], 0 }
   0x2   :  { %9 = vsyncpa [#allocation4], 0  ;;  %s15_s11 = sshll.u32 %s246_s0, 4  ;;  %s213_s12 = smov [#allocation2]   ;;  %s16_s11 = int_to_ptr.hbm [resolvable:$true] %s15_s11 }
   0x3   :  { %s17_s13 = sshll.u32 %s213_s12, 4  ;;  %s26_s16 = sshll.u32 %s247_s1, 4  ;;  %s18_s13 = int_to_ptr.vmem [resolvable:$true] %s17_s13  ;;  %s27_s16 = int_to_ptr.hbm [resolvable:$true] %s26_s16 }
   0x4   :  { %20 = dma.hbm_to_vmem [thread:$0]  %s16_s11, 128, %s18_s13, [#allocation3]  }
   0x5   :  { %s214_s17 = smov [#allocation5]  }
   0x6   :  { %s28_s18 = sshll.u32 %s214_s17, 4  ;;  %s29_s18 = int_to_ptr.vmem [resolvable:$true] %s28_s18 }
   0x7   :  { %31 = dma.hbm_to_vmem [thread:$0]  %s27_s16, 128, %s29_s18, [#allocation6]  }
   0x8   :  { %207 = dma.done.wait [#allocation3], 128  }
   0x9   :  { %208 = vsyncadd [#allocation3], 4294967168 }
   0xa   :  { %209 = dma.done.wait [#allocation6], 128  }
   0xb   :  { %210 = vsyncadd [#allocation6], 4294967168  ;;  %v40_v0 = vld [vmem:[#allocation2] sm:$0xff]  ;;  %v41_v1 = vld [vmem:[#allocation5] sm:$0xff]  ;;  %v62_v2 = vlaneseq  ;;  %vm68_vm1 = vcmask 64512   ;;  %s215_s0 = smov [#allocation7]  }
   0xc   :  { %57 = vmatpush.xpose.msra.mxu0 %v40_v0  ;;  %s115_s1 = sshll.u32 %s215_s0, 4  ;;  %s117_s22 = sshll.u32 %s248_s2, 4  ;;  %vm108_vm2 = vcmask 0   ;;  %s116_s1 = int_to_ptr.vmem [resolvable:$true] %s115_s1  ;;  %s118_s22 = int_to_ptr.hbm [resolvable:$true] %s117_s22 }
   0xd   :  { %v63_v3 = vshrl.u32 %v62_v2, 7  ;;  %v65_v4 = vand.u32 127, %v62_v2 }
   0xf   :  { %58 = vmatmul.f32.vlgmr.msra.gmra.mxu0 %v41_v1  ;;  %vm66_vm0 = vcmp.eq.s32.totalorder %v63_v3, %v65_v4 }
  0x8c   :  { %v59_v5 = vpop.f32.mrf.mxu0 }
  0x8d   :  { %v67_v6 = vsel %vm66_vm0, %v59_v5, 0.0 }
  0x8e   :  { %v69_v7 = vsel %vm68_vm1, %v67_v6, 0.0 }
  0x8f   :  { %v72_v8 = vrot.slane %v69_v7, 4  ;;  %70 = vadd.xlane.f32.xlu0 %v69_v7 }
  0x91   :  { %v73_v9 = vadd.f32 %v72_v8, %v69_v7 }
  0x93   :  { %v74_v10 = vrot.slane %v73_v9, 2 }
  0x95   :  { %v75_v11 = vadd.f32 %v74_v10, %v73_v9 }
  0x97   :  { %v76_v12 = vrot.slane %v75_v11, 1 }
  0x99   :  { %v77_v13 = vadd.f32 %v76_v12, %v75_v11 }
  0x9b   :  { %v81_v14 = vsub.f32 %v59_v5, %v77_v13 }
  0x9d   :  { %v82_v15 = vmax.f32 %v81_v14, 0.0 }
  0x9f   :  { %v84_v16 = vsel %vm66_vm0, 0.0, %v82_v15 }
  0xa0   :  { %v96_v17 = vsel %vm68_vm1, %v84_v16, 0.0 }
  0xa1   :  { %97 = vadd.xlane.f32.xlu1 %v96_v17 }
 0x102   :  { %v71_v18 = vpop.xlane.xlu0 %70 }
 0x103   :  { %v79_v19 = vsub.f32 %v59_v5, %v71_v18 }
 0x105   :  { %v80_v20 = vmax.f32 %v79_v19, 0.0 }
 0x107   :  { %v83_v21 = vsel %vm66_vm0, 0.0, %v80_v20 }
 0x108   :  { %v85_v22 = vsel %vm68_vm1, %v83_v21, 0.0 }
 0x109   :  { %86 = vadd.xlane.f32.xlu0 %v85_v22 }
 0x114   :  { %v98_v23 = vpop.xlane.xlu1 %97 }
 0x115   :  { %v99_v24 = vrot.slane %v98_v23, 4 }
 0x117   :  { %v100_v25 = vadd.f32 %v99_v24, %v98_v23 }
 0x119   :  { %v101_v26 = vrot.slane %v100_v25, 2 }
 0x11b   :  { %v102_v30 = vadd.f32 %v101_v26, %v100_v25 }
 0x11d   :  { %v103_v33 = vrot.slane %v102_v30, 1 }
 0x11f   :  { %v104_v36 = vadd.f32 %v103_v33, %v102_v30 }
 0x17c   :  { %v87_v27 = vpop.xlane.xlu0 %86 }
 0x17d   :  { %v88_v28 = vrot.slane %v87_v27, 4 }
 0x17f   :  { %v89_v29 = vadd.f32 %v88_v28, %v87_v27 }
 0x181   :  { %v90_v31 = vrot.slane %v89_v29, 2 }
 0x183   :  { %v91_v32 = vadd.f32 %v90_v31, %v89_v29 }
 0x185   :  { %v92_v34 = vrot.slane %v91_v32, 1 }
 0x187   :  { %v93_v35 = vadd.f32 %v92_v34, %v91_v32 }
 0x189   :  { %128 = vpush %v93_v35 }
 0x18a   :  { %130 = vpush %v104_v36 }
 0x1ba   :  { %s129_s19 = spop %128 }
 0x1bb   :  { %v95_v37 = vstv %s129_s19  ;;  %s131_s23 = spop %130 }
 0x1bc   :  { %v106_v38 = vstv %s131_s23 }
 0x1bd   :  { %v107_v39 = vadd.f32 %v106_v38, %v95_v37 }
 0x1bf   :  { %109 = vst.msk [vmem:[#allocation7] sm:$0x1] %vm108_vm2, %v107_v39 }
 0x1c0   :  { %120 = dma.vmem_to_hbm [thread:$0]  %s116_s1, 16, %s118_s22, [#allocation4]  }
 0x1c1   :  { %211 = dma.done.wait [#allocation4], 16  }
 0x1c2   :  { %212 = vsyncadd [#allocation4], 4294967280 }
 0x1c3   :  { %125 = vsyncpa [#allocation3], 1 }
 0x1c4   :  { %126 = vsyncpa [#allocation6], 1 }
 0x1c5   :  { %127 = vsyncpa [#allocation4], 1 }

</bundles_post_ra>
